<compile_context>
chip_gen: v7x
topology: tpu7x:2x2x1
jax: 0.10.0
libtpu: 0.0.40
codegen_flags: <defaults>
</compile_context>

<pallas_src>
import jax
import jax.numpy as jnp
import numpy as np
from jax.experimental import pallas as pl
from jax.experimental.pallas import tpu as pltpu


# ----------------------------- kernels -------------------------------------


def _mix_kernel(a_ref, x_ref, z_ref):
    # a_ref: (C, C) resident, x_ref/z_ref: (Bb, C, TT)
    a = a_ref[...]
    for i in range(x_ref.shape[0]):           # Bb is small and static
        z = jnp.dot(a, x_ref[i], preferred_element_type=jnp.float32)
        z_ref[i] = z.astype(z_ref.dtype)


def _mix_mask_kernel(a_ref, x_ref, m_ref, z_ref):
    # m_ref: (Bb, 1, TT) f32 -- broadcast over the C (sublane) axis.
    a = a_ref[...]
    for i in range(x_ref.shape[0]):
        z = jnp.dot(a, x_ref[i], preferred_element_type=jnp.float32)
        z_ref[i] = (z * m_ref[i]).astype(z_ref.dtype)


# ----------------------------- tiling heuristics -----------------------------


def _choose_tiles(b, c, t, itemsize):
    """Pick (Bb, TT) so each grid step moves ~2-4 MiB, tiles stay lane-dense,
    and there are enough steps to shard across v7x's two TensorCores."""
    max_tt = 2048
    if t <= max_tt:
        tt = t                                              # full-T: always layout-legal
    else:
        n_tiles = pl.cdiv(t, max_tt)
        tt = 128 * pl.cdiv(pl.cdiv(t, n_tiles), 128)        # balanced 128-multiple tiles

    step_bytes = 2 * c * tt * itemsize                      # in + out per batch row
    target_bytes = 4 * 1024 * 1024
    bb = max(1, min(b, target_bytes // max(step_bytes, 1)))

    # Keep >= ~8 grid steps (2 TCs on v7x) as long as a step stays >= ~1 MiB.
    min_step_bytes = 1 * 1024 * 1024
    while (bb > 1
           and pl.cdiv(b, bb) * pl.cdiv(t, tt) < 8
           and (bb // 2) * step_bytes >= min_step_bytes):
        bb //= 2
    return bb, tt


# ----------------------------- pallas wrapper --------------------------------


def _channel_mix(a, x, mask=None):
    """z[b, :, t] = a @ x[b, :, t] (optionally * mask[b, 0, t]), original layout."""
    b, c, t = x.shape
    itemsize = jnp.dtype(x.dtype).itemsize
    bb, tt = _choose_tiles(b, c, t, itemsize)
    grid = (pl.cdiv(b, bb), pl.cdiv(t, tt))

    a_spec = pl.BlockSpec((c, c), lambda bi, ti: (0, 0))           # resident weight
    x_spec = pl.BlockSpec((bb, c, tt), lambda bi, ti: (bi, 0, ti))
    z_spec = pl.BlockSpec((bb, c, tt), lambda bi, ti: (bi, 0, ti))

    # Homogeneous MXU operands (no per-step upcast of the activation tile).
    in_specs = [a_spec, x_spec]
    operands = [a.astype(x.dtype), x]
    kernel = _mix_kernel
    if mask is not None:
        in_specs.append(pl.BlockSpec((bb, 1, tt), lambda bi, ti: (bi, 0, ti)))
        operands.append(mask.astype(jnp.float32))                  # f32: matches z acc dtype
        kernel = _mix_mask_kernel

    bytes_accessed = 2 * b * c * t * itemsize + c * c * itemsize
    if mask is not None:
        bytes_accessed += b * t * 4

    # Per-step working set is kept at a few MiB by _choose_tiles, so a 32 MiB
    # scoped-VMEM cap is safe on every generation (v7x included).
    return pl.pallas_call(
        kernel,
        out_shape=jax.ShapeDtypeStruct((b, c, t), x.dtype),
        grid_spec=pltpu.PrefetchScalarGridSpec(
            num_scalar_prefetch=0,
            grid=grid,
            in_specs=in_specs,
            out_specs=z_spec,
        ),
        compiler_params=pltpu.CompilerParams(
            dimension_semantics=("parallel", "parallel"),
            vmem_limit_bytes=32 * 1024 * 1024,
        ),
        cost_estimate=pl.CostEstimate(
            flops=2 * c * c * t * b,
            transcendentals=0,
            bytes_accessed=int(bytes_accessed),
        ),
    )(*operands)


# ----------------------------- module forward --------------------------------


def inv_conv_near(x, weight, x_mask=None, reverse=False, no_jacobian=False):
    """Equivalent of InvConvNear.forward. x: (B, C, T)."""
    b, c, t = x.shape
    n_split = weight.shape[0]
    assert n_split % 2 == 0
    assert c % n_split == 0
    g = c // n_split
    ns2 = n_split // 2

    if x_mask is None:
        x_len = jnp.full((b,), float(t), dtype=jnp.float32)
        mask = None
    else:
        mask = x_mask.astype(x.dtype)                        # stays (B, 1, T)
        x_len = jnp.sum(x_mask.astype(jnp.float32), axis=(1, 2))

    if reverse:
        w = jnp.linalg.inv(weight.astype(jnp.float32))       # keep inverse in f32
        logdet = None
    else:
        w = weight.astype(jnp.float32)
        if no_jacobian:
            logdet = jnp.zeros((), dtype=jnp.float32)
        else:
            sign, logabs = jnp.linalg.slogdet(weight.astype(jnp.float32))
            # match torch.logdet: NaN for det<0, -inf for det==0
            logdet_w = jnp.where(sign < 0, jnp.float32(jnp.nan), logabs)
            logdet = logdet_w * jnp.float32(c / n_split) * x_len   # all f32

    # Fold regroup -> n_split x n_split mix -> ungroup into one c x c matrix so
    # the kernel works on the original (B, C, T) layout (no XLA transposes).
    #   chan = j1 * (g*ns2) + gi * ns2 + j2,  s = j1*ns2 + j2
    #   A[co, ci] = W[s(co), s(ci)] * delta(g(co), g(ci))
    w4 = w.reshape(2, ns2, 2, ns2)                           # W[(i1,i2),(j1,j2)]
    eye_g = jnp.eye(g, dtype=jnp.float32)
    a = (w4[:, None, :, :, None, :] * eye_g[None, :, None, None, :, None]).reshape(c, c)

    z = _channel_mix(a, x, mask)
    return z, logdet


def init_invconv_weight(key, n_split=4):
    """Deterministic replication of torch init: QR of a normal matrix, det > 0."""
    a = jax.random.normal(key, (n_split, n_split), dtype=jnp.float32)
    q, _ = jnp.linalg.qr(a)
    det = jnp.linalg.det(q)
    q_fixed = q.at[:, 0].set(-q[:, 0])
    return jnp.where(det < 0, q_fixed, q)


# ----------------------------- pure-JAX reference -----------------------------


def _reference(x, weight, mask):
    b, c, t = x.shape
    n_split = weight.shape[0]
    g = c // n_split
    x_g = x.reshape(b, 2, g, n_split // 2, t)
    x_g = jnp.transpose(x_g, (0, 1, 3, 2, 4)).reshape(b, n_split, g, t)
    z_g = jnp.einsum("ij,bjgt->bigt", weight, x_g)
    z = z_g.reshape(b, 2, n_split // 2, g, t)
    z = jnp.transpose(z, (0, 1, 3, 2, 4)).reshape(b, c, t)
    return z * mask


if __name__ == "__main__":
    key = jax.random.PRNGKey(0)
    k_w, k_x, k_x2 = jax.random.split(key, 3)

    b, c, t = 2, 8, 16
    n_split = 4

    weight = init_invconv_weight(k_w, n_split)
    x = jax.random.normal(k_x, (b, c, t), dtype=jnp.float32)

    # ---- forward, no mask ----
    z, logdet = inv_conv_near(x, weight)
    z = jax.block_until_ready(z)
    logdet = jax.block_until_ready(logdet)

    z_ref = _reference(x, weight, jnp.ones((b, 1, t), jnp.float32))
    np.testing.assert_allclose(np.asarray(z), np.asarray(z_ref), rtol=1e-5, atol=1e-5)

    _, logabs = jnp.linalg.slogdet(weight)
    logdet_ref = logabs * (c / n_split) * jnp.full((b,), float(t), jnp.float32)
    np.testing.assert_allclose(np.asarray(logdet), np.asarray(logdet_ref), rtol=1e-5, atol=1e-5)

    # ---- forward with a (B, 1, T) mask ----
    lengths = jnp.array([t, t - 5], dtype=jnp.int32)
    x_mask = (jnp.arange(t)[None, None, :] < lengths[:, None, None]).astype(jnp.float32)
    z_m, logdet_m = inv_conv_near(x, weight, x_mask=x_mask)
    z_m = jax.block_until_ready(z_m)
    z_ref_m = _reference(x, weight, x_mask)
    np.testing.assert_allclose(np.asarray(z_m), np.asarray(z_ref_m), rtol=1e-5, atol=1e-5)
    logdet_ref_m = logabs * (c / n_split) * jnp.sum(x_mask, axis=(1, 2))
    np.testing.assert_allclose(np.asarray(logdet_m), np.asarray(logdet_ref_m), rtol=1e-5, atol=1e-5)

    # ---- reverse (inverse) path must undo the forward ----
    x_rec, _ = inv_conv_near(z, weight, reverse=True)
    x_rec = jax.block_until_ready(x_rec)
    np.testing.assert_allclose(np.asarray(x_rec), np.asarray(x), rtol=1e-4, atol=1e-4)

    # ---- odd batch (exercises a partial multi-batch block) + mask ----
    b2, t2 = 3, 48
    x2 = jax.random.normal(k_x2, (b2, c, t2), dtype=jnp.float32)
    lengths2 = jnp.array([t2, t2 - 7, t2 - 20], dtype=jnp.int32)
    x_mask2 = (jnp.arange(t2)[None, None, :] < lengths2[:, None, None]).astype(jnp.float32)
    z2, _ = inv_conv_near(x2, weight, x_mask=x_mask2)
    z2 = jax.block_until_ready(z2)
    z2_ref = _reference(x2, weight, x_mask2)
    np.testing.assert_allclose(np.asarray(z2), np.asarray(z2_ref), rtol=1e-5, atol=1e-5)

    print("KERNEL_OK")
</pallas_src>

<mosaic_0001>
module attributes {stable_mosaic.version = 11 : i64} {
  func.func @_mix_kernel(%arg0: i32, %arg1: i32, %arg2: memref<8x8xf32, #tpu.memory_space<vmem>>, %arg3: memref<2x8x16xf32, #tpu.memory_space<vmem>>, %arg4: memref<2x8x16xf32, #tpu.memory_space<vmem>>) attributes {dimension_semantics = [#tpu.dimension_semantics<parallel>, #tpu.dimension_semantics<parallel>], iteration_bounds = array<i64: 1, 1>, scalar_prefetch = 0 : i64, scratch_operands = 0 : i64, tpu.core_type = #tpu.core_type<tc>, window_params = [{pipeline_mode = #tpu.pipeline_mode<synchronous>, transform_indices = @transform_0, window_bounds = array<i64: 8, 8>}, {transform_indices = @transform_1, window_bounds = array<i64: 2, 8, 16>}, {transform_indices = @transform_2, window_bounds = array<i64: 2, 8, 16>}]} {
    %c0 = arith.constant 0 : index
    %c0_0 = arith.constant 0 : index
    %0 = vector.load %arg2[%c0, %c0_0] : memref<8x8xf32, #tpu.memory_space<vmem>>, vector<8x8xf32>
    %c0_1 = arith.constant 0 : index
    %c0_2 = arith.constant 0 : index
    %c0_3 = arith.constant 0 : index
    %1 = vector.load %arg3[%c0_1, %c0_2, %c0_3] : memref<2x8x16xf32, #tpu.memory_space<vmem>>, vector<1x8x16xf32>
    %2 = vector.shape_cast %1 : vector<1x8x16xf32> to vector<8x16xf32>
    %cst = arith.constant dense<0.000000e+00> : vector<8x16xf32>
    %3 = tpu.matmul %0, %2, %cst {dimension_numbers = #tpu.dot_dimension_numbers<[1], [0], [0], [1], [0, 0, 1, 1], [], []>} : vector<8x8xf32>, vector<8x16xf32>, vector<8x16xf32> -> vector<8x16xf32>
    %c0_4 = arith.constant 0 : index
    %c0_5 = arith.constant 0 : index
    %c0_6 = arith.constant 0 : index
    %4 = vector.load %arg4[%c0_4, %c0_5, %c0_6] : memref<2x8x16xf32, #tpu.memory_space<vmem>>, vector<1x8x16xf32>
    %5 = vector.shape_cast %4 : vector<1x8x16xf32> to vector<8x16xf32>
    %6 = vector.shape_cast %3 : vector<8x16xf32> to vector<1x8x16xf32>
    tpu.vector_store %arg4[%c0_4, %c0_5, %c0_6], %6 {strides = array<i32>} : memref<2x8x16xf32, #tpu.memory_space<vmem>>, vector<1x8x16xf32>,
    %c1 = arith.constant 1 : index
    %c0_7 = arith.constant 0 : index
    %c0_8 = arith.constant 0 : index
    %7 = vector.load %arg3[%c1, %c0_7, %c0_8] : memref<2x8x16xf32, #tpu.memory_space<vmem>>, vector<1x8x16xf32>
    %8 = vector.shape_cast %7 : vector<1x8x16xf32> to vector<8x16xf32>
    %cst_9 = arith.constant dense<0.000000e+00> : vector<8x16xf32>
    %9 = tpu.matmul %0, %8, %cst_9 {dimension_numbers = #tpu.dot_dimension_numbers<[1], [0], [0], [1], [0, 0, 1, 1], [], []>} : vector<8x8xf32>, vector<8x16xf32>, vector<8x16xf32> -> vector<8x16xf32>
    %c1_10 = arith.constant 1 : index
    %c0_11 = arith.constant 0 : index
    %c0_12 = arith.constant 0 : index
    %10 = vector.load %arg4[%c1_10, %c0_11, %c0_12] : memref<2x8x16xf32, #tpu.memory_space<vmem>>, vector<1x8x16xf32>
    %11 = vector.shape_cast %10 : vector<1x8x16xf32> to vector<8x16xf32>
    %12 = vector.shape_cast %9 : vector<8x16xf32> to vector<1x8x16xf32>
    tpu.vector_store %arg4[%c1_10, %c0_11, %c0_12], %12 {strides = array<i32>} : memref<2x8x16xf32, #tpu.memory_space<vmem>>, vector<1x8x16xf32>,
    return
  }
  func.func @transform_0(%arg0: i32, %arg1: i32) -> (i32, i32) {
    %c0_i32 = arith.constant 0 : i32
    %c0_i32_0 = arith.constant 0 : i32
    %c0_i32_1 = arith.constant 0 : i32
    return %c0_i32, %c0_i32_0 : i32, i32
  }
  func.func @transform_1(%arg0: i32, %arg1: i32) -> (i32, i32, i32) {
    %c0_i32 = arith.constant 0 : i32
    %c0_i32_0 = arith.constant 0 : i32
    return %arg0, %c0_i32, %arg1 : i32, i32, i32
  }
  func.func @transform_2(%arg0: i32, %arg1: i32) -> (i32, i32, i32) {
    %c0_i32 = arith.constant 0 : i32
    %c0_i32_0 = arith.constant 0 : i32
    return %arg0, %c0_i32, %arg1 : i32, i32, i32
  }
}

</mosaic_0001>

<bundles_post_ra>
// kernel: tpu_custom_call.1
= control target key start
LH: loop header
LB: loop body
LE: loop exit
PB: predicated region body
PF: predicated region fallthrough
CT: control target
= control target key end

     0   :  { %7 = vsyncpa [#allocation3], 0  ;;  %s374_s0 = inlined_call_operand.hbm [shape: f32[8,8], index: 0, kind: input, shape index: {}]   ;;  %s375_s1 = inlined_call_operand.hbm [shape: f32[2,8,16], index: 1, kind: input, shape index: {}]   ;;  %s376_s2 = inlined_call_operand.hbm [shape: f32[2,8,16], index: 2, kind: output, shape index: {}]  }
   0x1   :  { %8 = vsyncpa [#allocation6], 0 }
   0x2   :  { %9 = vsyncpa [#allocation4], 0  ;;  %s303_s9 = smov [#allocation2]   ;;  %s304_s11 = smov [#allocation5]  }
   0x3   :  { %s16_s10 = sshll.u32 %s303_s9, 4  ;;  %s25_s12 = sshll.u32 %s304_s11, 4  ;;  %s17_s10 = int_to_ptr.vmem [resolvable:$true] %s16_s10  ;;  %s325_s12 = int_to_ptr.vmem [resolvable:$true] %s25_s12 }
   0x4   :  { %s231_s15 = scalar_lea.hbm %s374_s0, 128 }
   0x5   :  { %p232_p0 = scmp.ne.s32.totalorder %s374_s0, %s231_s15  ;;  %p235_p1 = scmp.lt.u32.totalorder %s231_s15, %s374_s0 }
   0x7   :  { %p237_p2 = pnand %p235_p1, %p232_p0 }
   0x9   :  { %240 = shalt.err (!%p237_p2)
}
   0xa   :  { %s241_s20 = scalar_lea.vmem %s17_s10, 128  ;;  %p246_p4 = scmp.lt.s32.totalorder %s17_s10, %s17_s10 }
   0xb   :  { %p242_p3 = scmp.ne.s32.totalorder %s17_s10, %s241_s20  ;;  %p247_p5 = scmp.lt.s32.totalorder %s241_s20, %s241_s20 }
   0xd   :  { %p248_p6 = por %p247_p5, %p246_p4 }
   0xf   :  { %p249_p7 = pnand %p248_p6, %p242_p3 }
  0x11   :  { %252 = shalt.err (!%p249_p7)
}
  0x12   :  { %19 = dma.hbm_to_vmem [thread:$0]  %s374_s0, 128, %s17_s10, [#allocation3]  }
  0x13   :  { %s253_s25 = scalar_lea.hbm %s375_s1, 256 }
  0x14   :  { %p254_p8 = scmp.ne.s32.totalorder %s375_s1, %s253_s25  ;;  %p257_p9 = scmp.lt.u32.totalorder %s253_s25, %s375_s1 }
  0x16   :  { %p259_p10 = pnand %p257_p9, %p254_p8 }
  0x18   :  { %262 = shalt.err (!%p259_p10)
}
  0x19   :  { %s263_s30 = scalar_lea.vmem %s325_s12, 256  ;;  %p268_p12 = scmp.lt.s32.totalorder %s325_s12, %s325_s12 }
  0x1a   :  { %p264_p11 = scmp.ne.s32.totalorder %s325_s12, %s263_s30  ;;  %p269_p13 = scmp.lt.s32.totalorder %s263_s30, %s263_s30 }
  0x1c   :  { %p270_p0 = por %p269_p13, %p268_p12 }
  0x1e   :  { %p271_p1 = pnand %p270_p0, %p264_p11 }
  0x20   :  { %274 = shalt.err (!%p271_p1)
}
  0x21   :  { %s305_s0 = smov 128   ;;  %s306_s3 = smov 8  }
  0x22   :  { %31 = dma.hbm_to_vmem [thread:$0]  %s375_s1, 256, %s325_s12, [#allocation6], %s305_s0, %s305_s0, %s306_s3  }
  0x23   :  { %297 = dma.done.wait [#allocation3], 128  }
  0x24   :  { %298 = vsyncadd [#allocation3], 4294967168 }
  0x25   :  { %299 = dma.done.wait [#allocation6], 256  }
  0x26   :  { %300 = vsyncadd [#allocation6], 4294967040  ;;  %v307_v0 = vmov 0.0   ;;  %vm308_vm0 = vmmov 0   ;;  %vm40_vm1 = vcmask 64512   ;;  %v39_v1 = vld [vmem:[#allocation5] sm:$0xff] }
  0x27   :  { %214 = vmatprep.subr.mxu0 %v307_v0  ;;  %219 = vmatprep.subr.mxu1 %v307_v0  ;;  %v117_v2 = vld [vmem:[#allocation5 + $0x8] sm:$0xff]  ;;  %v38_v3 = vld [vmem:[#allocation2] sm:$0xff]  ;;  %s309_s6 = smov [#allocation7]   ;;  %vm114_vm2 = vcmask 130048  }
  0x28   :  { %216 = vmatprep.mubr.msk.f32.mxu0 %vm308_vm0, %v307_v0  ;;  %221 = vmatprep.mubr.msk.f32.mxu1 %vm308_vm0, %v307_v0  ;;  %s195_s1 = sshll.u32 %s309_s6, 4  ;;  %s196_s1 = int_to_ptr.vmem [resolvable:$true] %s195_s1 }
  0x29   :  { %215 = vmatpush3.msra.mxu0 %v39_v1  ;;  %220 = vmatpush3.msra.mxu1 %v117_v2  ;;  %s275_s7 = scalar_lea.vmem %s196_s1, 256  ;;  %p280_p3 = scmp.lt.s32.totalorder %s196_s1, %s196_s1 }
  0x2a   :  { %217 = vmatmul.mubr.msk.f32.vlgmr.msra.gmra.mrb[0].mxu0 %vm40_vm1, %v38_v3  ;;  %222 = vmatmul.mubr.msk.f32.vlgmr.msra.gmra.mrb[0].mxu1 %vm40_vm1, %v38_v3  ;;  %p276_p2 = scmp.ne.s32.totalorder %s196_s1, %s275_s7  ;;  %p281_p4 = scmp.lt.s32.totalorder %s275_s7, %s275_s7 }
  0x2c   :  { %p282_p5 = por %p281_p4, %p280_p3 }
  0x2e   :  { %p283_p6 = pnand %p282_p5, %p276_p2 }
  0xfd   :  { %v110_v4 = vpop.f32.mrb[0].mxu0  ;;  %v184_v5 = vpop.f32.mrb[0].mxu1 }
  0xfe   :  { %115 = vst.msk [vmem:[#allocation7] sm:$0xff] %vm114_vm2, %v110_v4  ;;  %189 = vst.msk [vmem:[#allocation7 + $0x8] sm:$0xff] %vm114_vm2, %v184_v5  ;;  %v218_v6 = vpop.f32.mrb[1].mxu0  ;;  %v223_v7 = vpop.f32.mrb[1].mxu1 }
  0xff   :  { %286 = shalt.err (!%p283_p6)
}
 0x100   :  { %s287_s10 = scalar_lea.hbm %s376_s2, 256 }
 0x101   :  { %p288_p7 = scmp.ne.s32.totalorder %s376_s2, %s287_s10  ;;  %p291_p8 = scmp.lt.u32.totalorder %s287_s10, %s376_s2 }
 0x103   :  { %p293_p9 = pnand %p291_p8, %p288_p7 }
 0x105   :  { %296 = shalt.err (!%p293_p9)
}
 0x106   :  { %201 = dma.vmem_to_hbm [thread:$0]  %s196_s1, 256, %s376_s2, [#allocation4], %s305_s0, %s305_s0, %s306_s3  }
 0x107   :  { %301 = dma.done.wait [#allocation4], 256  }
 0x108   :  { %302 = vsyncadd [#allocation4], 4294967040 }
 0x109   :  { %205 = vsyncpa [#allocation3], 1 }
 0x10a   :  { %206 = vsyncpa [#allocation6], 1 }
 0x10b   :  { %207 = vsyncpa [#allocation4], 1 }

</bundles_post_ra>
